<compile_context>
chip_gen: v7x
topology: tpu7x:2x2x1
jax: 0.10.0
libtpu: 0.0.40
codegen_flags: <defaults>
</compile_context>

<pallas_src>
from functools import reduce as _reduce

import jax
import jax.numpy as jnp
from jax.experimental import pallas as pl
from jax.experimental.pallas import tpu as pltpu


# ----------------------------------------------------------------------------
# Fused kernel: y = sigmoid(x @ W + b)
# ----------------------------------------------------------------------------
def _linear_sigmoid_kernel(x_ref, w_ref, b_ref, o_ref):
    # MXU matmul: bf16 operands, f32 accumulation.
    x = x_ref[...].astype(jnp.bfloat16)
    y = jnp.dot(x, w_ref[...], preferred_element_type=jnp.float32)
    y = y + b_ref[...]  # bias add in f32
    # sigmoid = 1 / (1 + exp(-y)); exp on the EUP, divide as approx reciprocal
    # (also EUP) keeps the 1024-wide elementwise epilogue off the VALU.
    o_ref[...] = pl.reciprocal(1.0 + jnp.exp(-y), approx=True).astype(o_ref.dtype)


# ----------------------------------------------------------------------------
# Wrapper
# ----------------------------------------------------------------------------
def shallow_decoder_forward(x, w_bf16, bias, output_shape, *, batch_tile=256):
    """x: (B, latent_dim) f32, w_bf16: (latent_dim, out_units) bf16,
    bias: (1, out_units) f32.  Returns (B, *output_shape) f32."""
    B, K = x.shape
    N = w_bf16.shape[1]

    if B > batch_tile and B % batch_tile == 0:
        # Large-batch path: tile over batch, shard across TensorCores (v7x has
        # 2 TCs and only 64 MiB VMEM), weights stay resident in VMEM per tile.
        out = pl.pallas_call(
            _linear_sigmoid_kernel,
            out_shape=jax.ShapeDtypeStruct((B, N), jnp.float32),
            grid=(B // batch_tile,),
            in_specs=[
                pl.BlockSpec((batch_tile, K), lambda i: (i, 0)),
                pl.BlockSpec((K, N), lambda i: (0, 0)),
                pl.BlockSpec((1, N), lambda i: (0, 0)),
            ],
            out_specs=pl.BlockSpec((batch_tile, N), lambda i: (i, 0)),
            compiler_params=pltpu.CompilerParams(
                dimension_semantics=("parallel",),
                vmem_limit_bytes=64 << 20,
            ),
        )(x, w_bf16, bias)
    else:
        # Small-batch path: no grid, whole operands resident in VMEM, one shot.
        out = pl.pallas_call(
            _linear_sigmoid_kernel,
            out_shape=jax.ShapeDtypeStruct((B, N), jnp.float32),
            in_specs=[
                pl.BlockSpec(memory_space=pltpu.MemorySpace.VMEM),
                pl.BlockSpec(memory_space=pltpu.MemorySpace.VMEM),
                pl.BlockSpec(memory_space=pltpu.MemorySpace.VMEM),
            ],
            out_specs=pl.BlockSpec(memory_space=pltpu.MemorySpace.VMEM),
        )(x, w_bf16, bias)

    return out.reshape((-1,) + tuple(output_shape))


# ----------------------------------------------------------------------------
# Parameter construction (PyTorch nn.Linear default init, deterministic)
# ----------------------------------------------------------------------------
def init_params(key, latent_dim, output_shape):
    out_units = _reduce(lambda a, b: a * b, output_shape)
    kw, kb = jax.random.split(key)
    bound = 1.0 / (latent_dim ** 0.5)
    w = jax.random.uniform(kw, (latent_dim, out_units), jnp.float32, -bound, bound)
    b = jax.random.uniform(kb, (1, out_units), jnp.float32, -bound, bound)
    # weights stored in bf16 (matmul accumulates in f32); bias stays f32
    return w.astype(jnp.bfloat16), b


if __name__ == "__main__":
    latent_dim = 32
    output_shape = (4, 16, 16)   # out_units = 1024 (lane-dense: multiple of 128)
    batch = 8

    key = jax.random.PRNGKey(0)
    kp, kx = jax.random.split(key)
    w_bf16, bias = init_params(kp, latent_dim, output_shape)
    x = jax.random.normal(kx, (batch, latent_dim), jnp.float32)

    out = shallow_decoder_forward(x, w_bf16, bias, output_shape)
    out = jax.block_until_ready(out)

    # Shape check: view(-1, *output_shape)
    assert out.shape == (batch,) + output_shape

    # Numerical check against a pure-JAX reference (same bf16 weights, exact
    # sigmoid); only the approx reciprocal differs.
    ref = jax.nn.sigmoid(
        x @ w_bf16.astype(jnp.float32) + bias
    ).reshape((-1,) + output_shape)
    assert jnp.allclose(out, ref, atol=2e-3, rtol=2e-3)
    assert bool(jnp.all((out >= -1e-3) & (out <= 1.0 + 1e-3)))

    print("KERNEL_OK")
</pallas_src>

<mosaic_0001>
module attributes {stable_mosaic.version = 11 : i64} {
  func.func @_linear_sigmoid_kernel(%arg0: memref<8x32xf32, #tpu.memory_space<vmem>>, %arg1: memref<32x1024xbf16, #tpu.memory_space<vmem>>, %arg2: memref<1x1024xf32, #tpu.memory_space<vmem>>, %arg3: memref<8x1024xf32, #tpu.memory_space<vmem>>) attributes {dimension_semantics = [], scalar_prefetch = 0 : i64, scratch_operands = 0 : i64, tpu.core_type = #tpu.core_type<tc>} {
    %c0 = arith.constant 0 : index
    %c0_0 = arith.constant 0 : index
    %0 = vector.load %arg0[%c0, %c0_0] : memref<8x32xf32, #tpu.memory_space<vmem>>, vector<8x32xf32>
    %1 = arith.truncf %0 : vector<8x32xf32> to vector<8x32xbf16>
    %c0_1 = arith.constant 0 : index
    %c0_2 = arith.constant 0 : index
    %2 = vector.load %arg1[%c0_1, %c0_2] : memref<32x1024xbf16, #tpu.memory_space<vmem>>, vector<32x1024xbf16>
    %cst = arith.constant dense<0.000000e+00> : vector<8x1024xf32>
    %3 = tpu.matmul %1, %2, %cst {dimension_numbers = #tpu.dot_dimension_numbers<[1], [0], [0], [1], [0, 0, 1, 1], [], []>} : vector<8x32xbf16>, vector<32x1024xbf16>, vector<8x1024xf32> -> vector<8x1024xf32>
    %c0_3 = arith.constant 0 : index
    %c0_4 = arith.constant 0 : index
    %4 = vector.load %arg2[%c0_3, %c0_4] : memref<1x1024xf32, #tpu.memory_space<vmem>>, vector<1x1024xf32>
    %5 = vector.broadcast %4 : vector<1x1024xf32> to vector<8x1024xf32>
    %6 = arith.addf %3, %5 : vector<8x1024xf32>
    %cst_5 = arith.constant 0.000000e+00 : f32
    %7 = vector.broadcast %cst_5 : f32 to vector<8x1024xf32>
    %8 = arith.subf %7, %6 : vector<8x1024xf32>
    %9 = math.exp %8 : vector<8x1024xf32>
    %cst_6 = arith.constant 1.000000e+00 : f32
    %10 = vector.broadcast %cst_6 : f32 to vector<8x1024xf32>
    %11 = arith.addf %10, %9 : vector<8x1024xf32>
    %12 = tpu.reciprocal %11 {approx = true} : vector<8x1024xf32> -> vector<8x1024xf32>
    %c0_7 = arith.constant 0 : index
    %c0_8 = arith.constant 0 : index
    %13 = vector.load %arg3[%c0_7, %c0_8] : memref<8x1024xf32, #tpu.memory_space<vmem>>, vector<8x1024xf32>
    tpu.vector_store %arg3[%c0_7, %c0_8], %12 {strides = array<i32>} : memref<8x1024xf32, #tpu.memory_space<vmem>>, vector<8x1024xf32>,
    return
  }
}

</mosaic_0001>

<bundles_post_ra>
// kernel: tpu_custom_call.1
= control target key start
LH: loop header
LB: loop body
LE: loop exit
PB: predicated region body
PF: predicated region fallthrough
CT: control target
= control target key end

     0   :  { %8 = vsyncpa [#allocation3], 0  ;;  %s657_s0 = inlined_call_operand.hbm [shape: f32[8,32], index: 0, kind: input, shape index: {}]   ;;  %s658_s1 = inlined_call_operand.hbm [shape: bf16[32,1024], index: 1, kind: input, shape index: {}]   ;;  %s659_s2 = inlined_call_operand.hbm [shape: f32[1,1024], index: 2, kind: input, shape index: {}]   ;;  %s660_s3 = inlined_call_operand.hbm [shape: f32[8,1024], index: 3, kind: output, shape index: {}]  }
   0x1   :  { %9 = vsyncpa [#allocation6], 0 }
   0x2   :  { %10 = vsyncpa [#allocation4], 0  ;;  %s578_s12 = smov [#allocation5]   ;;  %s484_s16 = scalar_lea.hbm %s658_s1, 2048 }
   0x3   :  { %s26_s13 = sshll.u32 %s578_s12, 4  ;;  %p485_p0 = scmp.ne.s32.totalorder %s658_s1, %s484_s16  ;;  %s27_s13 = int_to_ptr.vmem [resolvable:$true] %s26_s13 }
   0x4   :  { %p488_p1 = scmp.lt.u32.totalorder %s484_s16, %s658_s1 }
   0x6   :  { %p490_p2 = pnand %p488_p1, %p485_p0 }
   0x8   :  { %493 = shalt.err (!%p490_p2)
}
   0x9   :  { %s494_s21 = scalar_lea.vmem %s27_s13, 2048  ;;  %p499_p4 = scmp.lt.s32.totalorder %s27_s13, %s27_s13 }
   0xa   :  { %p495_p3 = scmp.ne.s32.totalorder %s27_s13, %s494_s21  ;;  %p500_p5 = scmp.lt.s32.totalorder %s494_s21, %s494_s21 }
   0xc   :  { %p501_p6 = por %p500_p5, %p499_p4 }
   0xe   :  { %p502_p7 = pnand %p501_p6, %p495_p3 }
  0x10   :  { %505 = shalt.err (!%p502_p7)
}
  0x11   :  { %s579_s22 = smov 512   ;;  %s580_s23 = smov 32  }
  0x12   :  { %32 = dma.hbm_to_vmem [thread:$0]  %s658_s1, 2048, %s27_s13, [#allocation6], %s579_s22, %s579_s22, %s580_s23  }
  0x13   :  { %s581_s26 = smov [#allocation2]   ;;  %s582_s28 = smov [#allocation7]  }
  0x14   :  { %s17_s27 = sshll.u32 %s581_s26, 4  ;;  %s39_s29 = sshll.u32 %s582_s28, 4  ;;  %s18_s27 = int_to_ptr.vmem [resolvable:$true] %s17_s27  ;;  %s40_s29 = int_to_ptr.vmem [resolvable:$true] %s39_s29 }
  0x15   :  { %s506_s5 = scalar_lea.hbm %s657_s0, 128 }
  0x16   :  { %p507_p8 = scmp.ne.s32.totalorder %s657_s0, %s506_s5  ;;  %p510_p9 = scmp.lt.u32.totalorder %s506_s5, %s657_s0 }
  0x18   :  { %p512_p10 = pnand %p510_p9, %p507_p8 }
  0x1a   :  { %515 = shalt.err (!%p512_p10)
}
  0x1b   :  { %s516_s1 = scalar_lea.vmem %s18_s27, 128  ;;  %p521_p12 = scmp.lt.s32.totalorder %s18_s27, %s18_s27 }
  0x1c   :  { %p517_p11 = scmp.ne.s32.totalorder %s18_s27, %s516_s1  ;;  %p522_p13 = scmp.lt.s32.totalorder %s516_s1, %s516_s1 }
  0x1e   :  { %p523_p0 = por %p522_p13, %p521_p12 }
  0x20   :  { %p524_p1 = pnand %p523_p0, %p517_p11 }
  0x22   :  { %527 = shalt.err (!%p524_p1)
}
  0x23   :  { %20 = dma.hbm_to_vmem [thread:$0]  %s657_s0, 128, %s18_s27, [#allocation3]  }
  0x24   :  { %s528_s14 = scalar_lea.hbm %s659_s2, 128 }
  0x25   :  { %p529_p2 = scmp.ne.s32.totalorder %s659_s2, %s528_s14  ;;  %p532_p3 = scmp.lt.u32.totalorder %s528_s14, %s659_s2 }
  0x27   :  { %p534_p4 = pnand %p532_p3, %p529_p2 }
  0x29   :  { %537 = shalt.err (!%p534_p4)
}
  0x2a   :  { %s538_s19 = scalar_lea.vmem %s40_s29, 128  ;;  %p543_p6 = scmp.lt.s32.totalorder %s40_s29, %s40_s29 }
  0x2b   :  { %p539_p5 = scmp.ne.s32.totalorder %s40_s29, %s538_s19  ;;  %p544_p7 = scmp.lt.s32.totalorder %s538_s19, %s538_s19 }
  0x2d   :  { %p545_p8 = por %p544_p7, %p543_p6 }
  0x2f   :  { %p546_p9 = pnand %p545_p8, %p539_p5 }
  0x31   :  { %549 = shalt.err (!%p546_p9)
}
  0x32   :  { %42 = dma.hbm_to_vmem [thread:$0]  %s659_s2, 128, %s40_s29, [#allocation6]  }
  0x33   :  { %572 = dma.done.wait [#allocation3], 128  }
  0x34   :  { %573 = vsyncadd [#allocation3], 4294967168 }
  0x35   :  { %574 = dma.done.wait [#allocation6], 2176  }
  0x36   :  { %575 = vsyncadd [#allocation6], 4294965120  ;;  %v583_v0 = vmov 0   ;;  %v55_v1 = vld [vmem:[#allocation5] sm:$0xff]  ;;  %v56_v3 = vld [vmem:[#allocation5 + $0x8] sm:$0xff]  ;;  %vm193_vm0 = vcmask 261120   ;;  %v73_v35 = vlaneseq }
  0x37   :  { %229 = vmatprep.mubr.bf16.mxu0 %v583_v0  ;;  %270 = vmatprep.mubr.bf16.mxu1 %v583_v0  ;;  %v59_v2 = vld [vmem:[#allocation5 + $0x20] sm:$0xff]  ;;  %v60_v5 = vld [vmem:[#allocation5 + $0x28] sm:$0xff]  ;;  %v57_v15 = vld [vmem:[#allocation5 + $0x10] sm:$0xff]  ;;  %s584_s2 = smov [#allocation8]  }
  0x38   :  { %v426_v4 = vcombine.high %v55_v1, %v59_v2  ;;  %v425_v6 = vcombine.low %v55_v1, %v59_v2  ;;  %v63_v7 = vld [vmem:[#allocation5 + $0x40] sm:$0xff]  ;;  %v428_v9 = vcombine.high %v56_v3, %v60_v5  ;;  %v427_v10 = vcombine.low %v56_v3, %v60_v5  ;;  %v64_v12 = vld [vmem:[#allocation5 + $0x48] sm:$0xff]  ;;  %v61_v16 = vld [vmem:[#allocation5 + $0x30] sm:$0xff]  ;;  %s415_s21 = sshll.u32 %s584_s2, 4  ;;  %s416_s21 = int_to_ptr.vmem [resolvable:$true] %s415_s21 }
  0x39   :  { %v67_v8 = vld [vmem:[#allocation5 + $0x60] sm:$0xff]  ;;  %v68_v13 = vld [vmem:[#allocation5 + $0x68] sm:$0xff]  ;;  %v58_v17 = vld [vmem:[#allocation5 + $0x18] sm:$0xff]  ;;  %v430_v22 = vcombine.high %v57_v15, %v61_v16  ;;  %v429_v29 = vcombine.low %v57_v15, %v61_v16  ;;  %v74_v36 = vshrl.u32 %v73_v35, 7  ;;  %s550_s22 = scalar_lea.vmem %s416_s21, 1024  ;;  %p555_p11 = scmp.lt.s32.totalorder %s416_s21, %s416_s21 }
  0x3a   :  { %v434_v11 = vcombine.high %v63_v7, %v67_v8  ;;  %197 = vmatprep.subr.bf16.mxu0 %v426_v4  ;;  %v436_v14 = vcombine.high %v64_v12, %v68_v13  ;;  %238 = vmatprep.subr.bf16.mxu1 %v428_v9  ;;  %v433_v18 = vcombine.low %v63_v7, %v67_v8  ;;  %v53_v19 = vld [vmem:[#allocation2] sm:$0xff]  ;;  %v65_v24 = vld [vmem:[#allocation5 + $0x50] sm:$0xff]  ;;  %v71_v38 = vld [vmem:[#allocation7] sm:$0xff]  ;;  %p551_p10 = scmp.ne.s32.totalorder %s416_s21, %s550_s22  ;;  %p556_p12 = scmp.lt.s32.totalorder %s550_s22, %s550_s22 }
  0x3b   :  { %198 = vmatpush1.bf16.msra.mxu0 %v425_v6  ;;  %v62_v20 = vld [vmem:[#allocation5 + $0x38] sm:$0xff]  ;;  %239 = vmatpush1.bf16.msra.mxu1 %v427_v10  ;;  %v435_v21 = vcombine.low %v64_v12, %v68_v13  ;;  %v69_v25 = vld [vmem:[#allocation5 + $0x70] sm:$0xff]  ;;  %v54_v26 = vpack.c.bf16 %v53_v19, %v53_v19  ;;  %v75_v37 = vsub.s32 0, %v74_v36  ;;  %v83_v39 = vsub.s32 2, %v74_v36 }
  0x3c   :  { %199 = vmatprep.subr.bf16.mxu0 %v434_v11  ;;  %240 = vmatprep.subr.bf16.mxu1 %v436_v14  ;;  %v432_v23 = vcombine.high %v58_v17, %v62_v20  ;;  %v66_v27 = vld [vmem:[#allocation5 + $0x58] sm:$0xff]  ;;  %v431_v30 = vcombine.low %v58_v17, %v62_v20  ;;  %v438_v31 = vcombine.high %v65_v24, %v69_v25  ;;  %v79_v40 = vsub.s32 1, %v74_v36  ;;  %p557_p13 = por %p556_p12, %p555_p11 }
  0x3d   :  { %v70_v28 = vld [vmem:[#allocation5 + $0x78] sm:$0xff]  ;;  %v437_v33 = vcombine.low %v65_v24, %v69_v25  ;;  %v87_v41 = vsub.s32 3, %v74_v36  ;;  %v76_v42 = vrot.slane %v71_v38, %v75_v37  ;;  %v84_v43 = vrot.slane %v71_v38, %v83_v39 }
  0x3e   :  { %v440_v32 = vcombine.high %v66_v27, %v70_v28  ;;  %v439_v34 = vcombine.low %v66_v27, %v70_v28  ;;  %v80_v44 = vrot.slane %v71_v38, %v79_v40  ;;  %v91_v50 = vsub.s32 4, %v74_v36  ;;  %p558_p0 = pnand %p557_p13, %p551_p10 }
  0x3f   :  { %200 = vmatpush1.bf16.msra.mxu0 %v433_v18  ;;  %241 = vmatpush1.bf16.msra.mxu1 %v435_v21  ;;  %v88_v45 = vrot.slane %v71_v38, %v87_v41  ;;  %v99_v55 = vsub.s32 6, %v74_v36  ;;  %v95_v56 = vsub.s32 5, %v74_v36  ;;  %v103_v61 = vsub.s32 7, %v74_v36 }
  0x40   :  { %279 = vmatprep.subr.bf16.mxu0 %v430_v22  ;;  %320 = vmatprep.subr.bf16.mxu1 %v432_v23  ;;  %v92_v3 = vrot.slane %v71_v38, %v91_v50 }
  0x41   :  { %v100_v6 = vrot.slane %v71_v38, %v99_v55  ;;  %v96_v7 = vrot.slane %v71_v38, %v95_v56  ;;  %v104_v9 = vrot.slane %v71_v38, %v103_v61 }
  0x42   :  { %441 = vmatmul.mubr.msk.bf16.vlgmr.msra.gmra.mrb[0].mxu0 %vm193_vm0, %v54_v26  ;;  %442 = vmatmul.mubr.msk.bf16.vlgmr.msra.gmra.mrb[0].mxu1 %vm193_vm0, %v54_v26 }
  0x43   :  { %280 = vmatpush1.bf16.msra.mxu0 %v429_v29  ;;  %321 = vmatpush1.bf16.msra.mxu1 %v431_v30 }
  0x44   :  { %281 = vmatprep.subr.bf16.mxu0 %v438_v31  ;;  %322 = vmatprep.subr.bf16.mxu1 %v440_v32 }
  0x45   :  { %311 = vmatprep.mubr.bf16.mxu0 %v583_v0  ;;  %352 = vmatprep.mubr.bf16.mxu1 %v583_v0 }
  0x47   :  { %282 = vmatpush1.bf16.msra.mxu0 %v437_v33  ;;  %323 = vmatpush1.bf16.msra.mxu1 %v439_v34 }
  0x4a   :  { %443 = vmatmul.mubr.msk.bf16.vlgmr.msra.gmra.mrb[4].mxu0 %vm193_vm0, %v54_v26  ;;  %444 = vmatmul.mubr.msk.bf16.vlgmr.msra.gmra.mrb[4].mxu1 %vm193_vm0, %v54_v26 }
 0x115   :  { %v231_v46 = vpop.f32.mrb[0].mxu0  ;;  %v272_v48 = vpop.f32.mrb[0].mxu1 }
 0x116   :  { %v232_v47 = vadd.f32 %v231_v46, %v76_v42  ;;  %v233_v49 = vpop.f32.mrb[1].mxu0  ;;  %v273_v51 = vadd.f32 %v272_v48, %v84_v43  ;;  %v274_v53 = vpop.f32.mrb[1].mxu1 }
 0x117   :  { %v234_v52 = vadd.f32 %v233_v49, %v80_v44  ;;  %v235_v54 = vpop.f32.mrb[2].mxu0  ;;  %v275_v58 = vadd.f32 %v274_v53, %v88_v45  ;;  %v276_v59 = vpop.f32.mrb[2].mxu1 }
 0x118   :  { %v361_v57 = vsub.f32 0.0, %v232_v47  ;;  %v236_v60 = vpop.f32.mrb[3].mxu0  ;;  %v363_v62 = vsub.f32 0.0, %v273_v51  ;;  %v277_v0 = vpop.f32.mrb[3].mxu1 }
 0x119   :  { %v362_v63 = vsub.f32 0.0, %v234_v52  ;;  %v364_v2 = vsub.f32 0.0, %v275_v58 }
 0x11a   :  { %v369_v1 = vmul.f32 1.442695, %v361_v57  ;;  %v373_v4 = vmul.f32 1.442695, %v363_v62 }
 0x11b   :  { %v371_v5 = vmul.f32 1.442695, %v362_v63  ;;  %v375_v8 = vmul.f32 1.442695, %v364_v2 }
 0x11c   :  { %452 = vpow2.f32 %v369_v1 }
 0x11d   :  { %454 = vpow2.f32 %v373_v4  ;;  %v313_v10 = vpop.f32.mrb[4].mxu0  ;;  %v354_v12 = vpop.f32.mrb[4].mxu1 }
 0x11e   :  { %456 = vpow2.f32 %v371_v5  ;;  %v314_v11 = vadd.f32 %v313_v10, %v92_v3  ;;  %v315_v13 = vpop.f32.mrb[5].mxu0  ;;  %v355_v14 = vadd.f32 %v354_v12, %v100_v6  ;;  %v356_v16 = vpop.f32.mrb[5].mxu1 }
 0x11f   :  { %458 = vpow2.f32 %v375_v8  ;;  %v316_v15 = vadd.f32 %v315_v13, %v96_v7  ;;  %v317_v17 = vpop.f32.mrb[6].mxu0  ;;  %v357_v19 = vadd.f32 %v356_v16, %v104_v9  ;;  %v358_v20 = vpop.f32.mrb[6].mxu1 }
 0x120   :  { %v365_v18 = vsub.f32 0.0, %v314_v11  ;;  %v318_v21 = vpop.f32.mrb[7].mxu0  ;;  %v367_v22 = vsub.f32 0.0, %v355_v14  ;;  %v359_v24 = vpop.f32.mrb[7].mxu1 }
 0x121   :  { %v366_v23 = vsub.f32 0.0, %v316_v15  ;;  %v368_v26 = vsub.f32 0.0, %v357_v19 }
 0x122   :  { %v377_v25 = vmul.f32 1.442695, %v365_v18  ;;  %v381_v27 = vmul.f32 1.442695, %v367_v22 }
 0x123   :  { %v379_v28 = vmul.f32 1.442695, %v366_v23  ;;  %v383_v29 = vmul.f32 1.442695, %v368_v26 }
 0x124   :  { %460 = vpow2.f32 %v377_v25 }
 0x125   :  { %462 = vpow2.f32 %v381_v27 }
 0x126   :  { %v453_v30 = vpop.eup %452  ;;  %464 = vpow2.f32 %v379_v28 }
 0x127   :  { %v455_v31 = vpop.eup %454  ;;  %v385_v32 = vadd.f32 1.0, %v453_v30  ;;  %466 = vpow2.f32 %v383_v29 }
 0x128   :  { %v457_v33 = vpop.eup %456  ;;  %v387_v34 = vadd.f32 1.0, %v455_v31 }
 0x129   :  { %v459_v35 = vpop.eup %458  ;;  %468 = vrcp.f32 %v385_v32  ;;  %v386_v36 = vadd.f32 1.0, %v457_v33 }
 0x12a   :  { %470 = vrcp.f32 %v387_v34  ;;  %v388_v37 = vadd.f32 1.0, %v459_v35 }
 0x12b   :  { %472 = vrcp.f32 %v386_v36 }
 0x12c   :  { %474 = vrcp.f32 %v388_v37 }
 0x12e   :  { %v461_v38 = vpop.eup %460 }
 0x12f   :  { %v463_v39 = vpop.eup %462  ;;  %v389_v40 = vadd.f32 1.0, %v461_v38 }
 0x130   :  { %v465_v41 = vpop.eup %464  ;;  %v391_v42 = vadd.f32 1.0, %v463_v39 }
 0x131   :  { %v467_v43 = vpop.eup %466  ;;  %476 = vrcp.f32 %v389_v40  ;;  %v390_v44 = vadd.f32 1.0, %v465_v41 }
 0x132   :  { %478 = vrcp.f32 %v391_v42  ;;  %v392_v45 = vadd.f32 1.0, %v467_v43 }
 0x133   :  { %v469_v46 = vpop.eup %468  ;;  %480 = vrcp.f32 %v390_v44 }
 0x134   :  { %v471_v47 = vpop.eup %470  ;;  %401 = vst [vmem:[#allocation8] sm:$0xff] %v469_v46  ;;  %482 = vrcp.f32 %v392_v45 }
 0x135   :  { %v473_v48 = vpop.eup %472  ;;  %403 = vst [vmem:[#allocation8 + $0x10] sm:$0xff] %v471_v47 }
 0x136   :  { %v475_v49 = vpop.eup %474  ;;  %402 = vst [vmem:[#allocation8 + $0x8] sm:$0xff] %v473_v48 }
 0x137   :  { %404 = vst [vmem:[#allocation8 + $0x18] sm:$0xff] %v475_v49 }
 0x13b   :  { %v477_v50 = vpop.eup %476 }
 0x13c   :  { %v479_v51 = vpop.eup %478  ;;  %405 = vst [vmem:[#allocation8 + $0x20] sm:$0xff] %v477_v50 }
 0x13d   :  { %v481_v52 = vpop.eup %480  ;;  %407 = vst [vmem:[#allocation8 + $0x30] sm:$0xff] %v479_v51 }
 0x13e   :  { %v483_v53 = vpop.eup %482  ;;  %406 = vst [vmem:[#allocation8 + $0x28] sm:$0xff] %v481_v52 }
 0x13f   :  { %408 = vst [vmem:[#allocation8 + $0x38] sm:$0xff] %v483_v53 }
 0x140   :  { %561 = shalt.err (!%p558_p0)
}
 0x141   :  { %s562_s25 = scalar_lea.hbm %s660_s3, 1024 }
 0x142   :  { %p563_p1 = scmp.ne.s32.totalorder %s660_s3, %s562_s25  ;;  %p566_p2 = scmp.lt.u32.totalorder %s562_s25, %s660_s3 }
 0x144   :  { %p568_p3 = pnand %p566_p2, %p563_p1 }
 0x146   :  { %571 = shalt.err (!%p568_p3)
}
 0x147   :  { %418 = dma.vmem_to_hbm [thread:$0]  %s416_s21, 1024, %s660_s3, [#allocation4]  }
 0x148   :  { %576 = dma.done.wait [#allocation4], 1024  }
 0x149   :  { %577 = vsyncadd [#allocation4], 4294966272 }
 0x14a   :  { %422 = vsyncpa [#allocation3], 1 }
 0x14b   :  { %423 = vsyncpa [#allocation6], 1 }
 0x14c   :  { %424 = vsyncpa [#allocation4], 1 }

</bundles_post_ra>
